<compile_context>
chip_gen: v7x
topology: tpu7x:2x2x1
jax: 0.10.0
libtpu: 0.0.40
codegen_flags: <defaults>
</compile_context>

<pallas_src>
import math

import jax
import jax.numpy as jnp
from jax.experimental import pallas as pl
from jax.experimental.pallas import tpu as pltpu

SIGMA = 0.5

_LANE = 128
_SUBLANE = 8


def _stg_blend_kernel(gate_ref, prev_ref, perm_ref, out_ref):
    # gate: (1, bc) f32, broadcasts over the row (sublane) axis.
    gate = gate_ref[...]
    prev = prev_ref[...].astype(jnp.float32)
    perm = perm_ref[...].astype(jnp.float32)
    # Exact form so gate==0 / gate==1 return the corresponding input exactly.
    out_ref[...] = (prev * gate + perm * (1.0 - gate)).astype(out_ref.dtype)


def _stg_gate_kernel(gate_ref, prev_ref, out_ref):
    gate = gate_ref[...]
    out_ref[...] = (prev_ref[...].astype(jnp.float32) * gate).astype(out_ref.dtype)


def _chip_config():
    """Per-generation tiling parameters (conservative defaults if unknown)."""
    kind = ""
    try:
        kind = jax.devices()[0].device_kind.lower()
    except Exception:
        pass
    if "v7" in kind:
        # 3.2 TB/s HBM -> bigger tiles to amortize ~0.35us/step; 2 TCs/chip.
        return dict(vmem_budget=24 << 20, vmem_limit=32 << 20, multi_tc=True)
    if "v5e" in kind or "v5 lite" in kind or "v5lite" in kind:
        # 16 MiB scoped-VMEM default: pin the limit and keep tiles modest.
        return dict(vmem_budget=12 << 20, vmem_limit=16 << 20, multi_tc=False)
    # v6e / v4 / unknown.
    return dict(vmem_budget=16 << 20, vmem_limit=32 << 20, multi_tc=False)


def _lane_dense_layout(B, D):
    """Pick a lane-dense (rows, cols) view of a (B, D) array.

    Returns (B_pad, D_pad, rows, cols, reps):
      * the (B, D) array is zero-padded to (B_pad, D_pad),
      * then reshaped row-major to (rows, cols) with cols a multiple of 128,
      * the (D,) gate is tiled `reps` times (and zero-padded up to cols).
    """
    if D % _LANE == 0:
        return B, D, B, D, 1
    L = (D * _LANE) // math.gcd(D, _LANE)          # lcm(D, 128)
    reps = L // D
    B_pad_a = ((B + reps - 1) // reps) * reps       # option A: pad batch
    D_pad_b = ((D + _LANE - 1) // _LANE) * _LANE    # option B: pad feature dim
    if B_pad_a * D <= B * D_pad_b:                  # choose the cheaper padding
        return B_pad_a, D, (B_pad_a * D) // L, L, reps
    return B, D_pad_b, B, D_pad_b, 1


def stg_selector_forward(prev_x, permuted_x, mu, eps, *,
                         block_rows=None, block_cols=None):
    """Pallas implementation of STGSelector.forward.

    prev_x:      (B, D)
    permuted_x:  (B, D) or None
    mu, eps:     (D,)
    returns:     (B, D) in prev_x.dtype
    """
    B, D = prev_x.shape
    if permuted_x is not None:
        assert permuted_x.shape == prev_x.shape
    out_dtype = prev_x.dtype
    itemsize = jnp.dtype(out_dtype).itemsize

    cfg = _chip_config()

    # Tiny per-forward stochastic gate, computed once in the wrapper.
    gate = jnp.clip(
        mu.astype(jnp.float32) + SIGMA * eps.astype(jnp.float32) + 0.5, 0.0, 1.0)

    # --- lane-dense layout (always cols % 128 == 0; pad instead of masking) --
    B_pad, D_pad, rows, cols, reps = _lane_dense_layout(B, D)

    def to_lane_dense(x):
        if B_pad != B or D_pad != D:
            x = jnp.pad(x, ((0, B_pad - B), (0, D_pad - D)))
        return x.reshape(rows, cols)

    gate_row = jnp.tile(gate, reps) if reps > 1 else gate
    if gate_row.shape[0] != cols:
        gate_row = jnp.pad(gate_row, (0, cols - gate_row.shape[0]))
    gate_row = gate_row.reshape(1, cols)

    prev2 = to_lane_dense(prev_x)
    perm2 = to_lane_dense(permuted_x) if permuted_x is not None else None

    # --- tile sizing ---------------------------------------------------------
    n_stream = 2 if permuted_x is None else 3        # streamed HBM arrays (in+out)
    per_stream = max(cfg["vmem_budget"] // (2 * n_stream),   # 2x = double buffering
                     _SUBLANE * _LANE * itemsize)

    if block_cols is None:
        if cols * _SUBLANE * itemsize <= per_stream:
            block_cols = cols          # full-width rows -> fully contiguous DMA
        else:
            block_cols = max(_LANE,
                             (per_stream // (_SUBLANE * itemsize)) // _LANE * _LANE)
            block_cols = min(block_cols, cols)
    block_cols = int(block_cols)

    if block_rows is None:
        target_rows = per_stream // (block_cols * itemsize)
        target_rows = max(_SUBLANE, (target_rows // _SUBLANE) * _SUBLANE)
        block_rows = int(min(rows, target_rows))
        # v7x: 2 TensorCores -> make sure a 'parallel' axis has >= 2 tiles.
        if (cfg["multi_tc"] and rows >= 2 * _SUBLANE
                and pl.cdiv(rows, block_rows) * pl.cdiv(cols, block_cols) == 1):
            block_rows = max(_SUBLANE, ((rows // 2) // _SUBLANE) * _SUBLANE)
    block_rows = int(block_rows)

    # BlockSpec legality: (8,128)-divisible or full extent.
    assert block_rows == rows or block_rows % _SUBLANE == 0, block_rows
    assert block_cols == cols or block_cols % _LANE == 0, block_cols

    grid = (pl.cdiv(rows, block_rows), pl.cdiv(cols, block_cols))

    gate_spec = pl.BlockSpec((1, block_cols), lambda i, j: (0, j))
    mat_spec = pl.BlockSpec((block_rows, block_cols), lambda i, j: (i, j))

    if permuted_x is None:
        kernel = _stg_gate_kernel
        in_specs = [gate_spec, mat_spec]
        args = (gate_row, prev2)
        flops_per_elem = 1
    else:
        kernel = _stg_blend_kernel
        in_specs = [gate_spec, mat_spec, mat_spec]
        args = (gate_row, prev2, perm2)
        flops_per_elem = 4

    cost = pl.CostEstimate(
        flops=flops_per_elem * rows * cols,
        transcendentals=0,
        bytes_accessed=n_stream * rows * cols * itemsize + cols * 4,
    )

    out = pl.pallas_call(
        kernel,
        out_shape=jax.ShapeDtypeStruct((rows, cols), out_dtype),
        grid_spec=pltpu.PrefetchScalarGridSpec(
            num_scalar_prefetch=0,
            grid=grid,
            in_specs=in_specs,
            out_specs=mat_spec,
        ),
        compiler_params=pltpu.CompilerParams(
            dimension_semantics=("parallel", "parallel"),
            vmem_limit_bytes=int(cfg["vmem_limit"]),
        ),
        cost_estimate=cost,
    )(*args)

    out = out.reshape(B_pad, D_pad)
    if B_pad != B or D_pad != D:
        out = out[:B, :D]
    return out


def stg_selector_reference(prev_x, permuted_x, mu, eps):
    gate = jnp.clip(mu + SIGMA * eps + 0.5, 0.0, 1.0)
    if permuted_x is None:
        res = prev_x.astype(jnp.float32) * gate
    else:
        res = (prev_x.astype(jnp.float32) * gate
               + permuted_x.astype(jnp.float32) * (1.0 - gate))
    return res.astype(prev_x.dtype)


if __name__ == "__main__":
    key = jax.random.PRNGKey(0)

    def run_case(B, D, with_perm, key, dtype=jnp.float32, atol=1e-5):
        k_mu, k_eps, k_prev, k_perm = jax.random.split(key, 4)
        # Parameter init mirrors torch: mu = 0.01 * randn(input_dim)
        mu = 0.01 * jax.random.normal(k_mu, (D,), dtype=jnp.float32)
        # Fresh noise each forward (eps.normal_()), drawn deterministically here.
        eps = jax.random.normal(k_eps, (D,), dtype=jnp.float32)
        prev_x = jax.random.normal(k_prev, (B, D), dtype=jnp.float32).astype(dtype)
        permuted_x = (jax.random.normal(k_perm, (B, D), dtype=jnp.float32).astype(dtype)
                      if with_perm else None)

        out = jax.block_until_ready(stg_selector_forward(prev_x, permuted_x, mu, eps))
        ref = stg_selector_reference(prev_x, permuted_x, mu, eps)
        assert out.shape == ref.shape and out.dtype == ref.dtype, (out.shape, out.dtype)
        assert jnp.allclose(out.astype(jnp.float32), ref.astype(jnp.float32),
                            atol=atol, rtol=1e-5), (B, D, with_perm, dtype)

    keys = jax.random.split(key, 5)
    # Original demo size (D=32 -> lane-dense reshape to cols=128).
    run_case(8, 32, True, keys[0])
    # Gate-only path (permuted_x is None).
    run_case(8, 32, False, keys[1])
    # D already a multiple of 128 (no reshape path; v7x splits rows across TCs).
    run_case(16, 256, True, keys[2])
    # Awkward D: previously masked-store fallback, now padded lane-dense path.
    run_case(6, 40, True, keys[3])
    # bf16 streaming (half the HBM traffic; compute stays f32 in-registers).
    run_case(16, 256, True, keys[4], dtype=jnp.bfloat16, atol=2e-2)

    print("KERNEL_OK")
</pallas_src>

<mosaic_0001>
module attributes {stable_mosaic.version = 11 : i64} {
  func.func @_stg_blend_kernel(%arg0: i32, %arg1: i32, %arg2: memref<1x128xf32, #tpu.memory_space<vmem>>, %arg3: memref<2x128xf32, #tpu.memory_space<vmem>>, %arg4: memref<2x128xf32, #tpu.memory_space<vmem>>, %arg5: memref<2x128xf32, #tpu.memory_space<vmem>>) attributes {dimension_semantics = [#tpu.dimension_semantics<parallel>, #tpu.dimension_semantics<parallel>], iteration_bounds = array<i64: 1, 1>, scalar_prefetch = 0 : i64, scratch_operands = 0 : i64, tpu.core_type = #tpu.core_type<tc>, window_params = [{transform_indices = @transform_0, window_bounds = array<i64: 1, 128>}, {transform_indices = @transform_1, window_bounds = array<i64: 2, 128>}, {transform_indices = @transform_2, window_bounds = array<i64: 2, 128>}, {transform_indices = @transform_3, window_bounds = array<i64: 2, 128>}]} {
    %c0 = arith.constant 0 : index
    %c0_0 = arith.constant 0 : index
    %0 = vector.load %arg2[%c0, %c0_0] : memref<1x128xf32, #tpu.memory_space<vmem>>, vector<1x128xf32>
    %c0_1 = arith.constant 0 : index
    %c0_2 = arith.constant 0 : index
    %1 = vector.load %arg3[%c0_1, %c0_2] : memref<2x128xf32, #tpu.memory_space<vmem>>, vector<2x128xf32>
    %c0_3 = arith.constant 0 : index
    %c0_4 = arith.constant 0 : index
    %2 = vector.load %arg4[%c0_3, %c0_4] : memref<2x128xf32, #tpu.memory_space<vmem>>, vector<2x128xf32>
    %3 = vector.broadcast %0 : vector<1x128xf32> to vector<2x128xf32>
    %4 = arith.mulf %1, %3 : vector<2x128xf32>
    %cst = arith.constant 1.000000e+00 : f32
    %5 = vector.broadcast %cst : f32 to vector<1x128xf32>
    %6 = arith.subf %5, %0 : vector<1x128xf32>
    %7 = vector.broadcast %6 : vector<1x128xf32> to vector<2x128xf32>
    %8 = arith.mulf %2, %7 : vector<2x128xf32>
    %9 = arith.addf %4, %8 : vector<2x128xf32>
    %c0_5 = arith.constant 0 : index
    %c0_6 = arith.constant 0 : index
    %10 = vector.load %arg5[%c0_5, %c0_6] : memref<2x128xf32, #tpu.memory_space<vmem>>, vector<2x128xf32>
    tpu.vector_store %arg5[%c0_5, %c0_6], %9 {strides = array<i32>} : memref<2x128xf32, #tpu.memory_space<vmem>>, vector<2x128xf32>,
    return
  }
  func.func @transform_0(%arg0: i32, %arg1: i32) -> (i32, i32) {
    %c0_i32 = arith.constant 0 : i32
    %c0_i32_0 = arith.constant 0 : i32
    return %c0_i32, %arg1 : i32, i32
  }
  func.func @transform_1(%arg0: i32, %arg1: i32) -> (i32, i32) {
    %c0_i32 = arith.constant 0 : i32
    return %arg0, %arg1 : i32, i32
  }
  func.func @transform_2(%arg0: i32, %arg1: i32) -> (i32, i32) {
    %c0_i32 = arith.constant 0 : i32
    return %arg0, %arg1 : i32, i32
  }
  func.func @transform_3(%arg0: i32, %arg1: i32) -> (i32, i32) {
    %c0_i32 = arith.constant 0 : i32
    return %arg0, %arg1 : i32, i32
  }
}

</mosaic_0001>

<bundles_post_ra>
// kernel: tpu_custom_call.1
= control target key start
LH: loop header
LB: loop body
LE: loop exit
PB: predicated region body
PF: predicated region fallthrough
CT: control target
= control target key end

     0   :  { %8 = vsyncpa [#allocation3], 0  ;;  %s164_s0 = inlined_call_operand.hbm [shape: f32[1,128], index: 0, kind: input, shape index: {}]   ;;  %s165_s1 = inlined_call_operand.vmem [shape: f32[2,128], index: 1, kind: input, shape index: {}]   ;;  %s166_s2 = inlined_call_operand.vmem [shape: f32[2,128], index: 2, kind: input, shape index: {}]   ;;  %s167_s3 = inlined_call_operand.hbm [shape: f32[2,128], index: 3, kind: output, shape index: {}]  }
   0x1   :  { %9 = vsyncpa [#allocation4], 0  ;;  %s112_s12 = smov [#allocation2]   ;;  %s64_s16 = scalar_lea.hbm %s164_s0, 16 }
   0x2   :  { %s16_s13 = sshll.u32 %s112_s12, 4  ;;  %p65_p0 = scmp.ne.s32.totalorder %s164_s0, %s64_s16  ;;  %s17_s13 = int_to_ptr.vmem [resolvable:$true] %s16_s13 }
   0x3   :  { %p68_p1 = scmp.lt.u32.totalorder %s64_s16, %s164_s0 }
   0x5   :  { %p70_p2 = pnand %p68_p1, %p65_p0 }
   0x7   :  { %73 = shalt.err (!%p70_p2)
}
   0x8   :  { %s74_s21 = scalar_lea.vmem %s17_s13, 16  ;;  %s78_s22 = scalar_lea.vmem %s17_s13, 32 }
   0x9   :  { %p75_p3 = scmp.ne.s32.totalorder %s17_s13, %s74_s21  ;;  %p79_p4 = scmp.lt.s32.totalorder %s17_s13, %s17_s13 }
   0xa   :  { %p80_p5 = scmp.lt.s32.totalorder %s78_s22, %s74_s21 }
   0xc   :  { %p81_p6 = por %p80_p5, %p79_p4 }
   0xe   :  { %p82_p7 = pnand %p81_p6, %p75_p3 }
  0x10   :  { %85 = shalt.err (!%p82_p7)
}
  0x11   :  { %19 = dma.hbm_to_vmem [thread:$0]  %s164_s0, 16, %s17_s13, [#allocation3]  }
  0x12   :  { %108 = dma.done.wait [#allocation3], 16  }
  0x13   :  { %109 = vsyncadd [#allocation3], 4294967280  ;;  %v31_v0 = vlaneseq  ;;  %v27_v3 = vld [vmem:[#allocation2] sm:$0x1]  ;;  %v28_v4 = vld [vmem:[%s165_s1] sm:$0x3] }
  0x14   :  { %v37_v6 = vsub.f32 1.0, %v27_v3  ;;  %v29_v7 = vld [vmem:[%s166_s2] sm:$0x3]  ;;  %s113_s29 = smov [#allocation5]  }
  0x15   :  { %v32_v1 = vshrl.u32 %v31_v0, 7  ;;  %s53_s0 = sshll.u32 %s113_s29, 4  ;;  %s54_s0 = int_to_ptr.vmem [resolvable:$true] %s53_s0 }
  0x16   :  { %s86_s30 = scalar_lea.vmem %s54_s0, 32  ;;  %p91_p9 = scmp.lt.s32.totalorder %s54_s0, %s54_s0 }
  0x17   :  { %v33_v2 = vsub.s32 0, %v32_v1  ;;  %p87_p8 = scmp.ne.s32.totalorder %s54_s0, %s86_s30  ;;  %p92_p10 = scmp.lt.s32.totalorder %s86_s30, %s86_s30 }
  0x19   :  { %v34_v5 = vrot.slane %v27_v3, %v33_v2  ;;  %v42_v9 = vrot.slane %v37_v6, %v33_v2  ;;  %p93_p11 = por %p92_p10, %p91_p9 }
  0x1b   :  { %v36_v8 = vmul.f32 %v34_v5, %v28_v4  ;;  %v44_v10 = vmul.f32 %v42_v9, %v29_v7  ;;  %p94_p12 = pnand %p93_p11, %p87_p8 }
  0x1d   :  { %v45_v11 = vadd.f32 %v44_v10, %v36_v8 }
  0x1f   :  { %46 = vst [vmem:[#allocation5] sm:$0x3] %v45_v11 }
  0x20   :  { %97 = shalt.err (!%p94_p12)
}
  0x21   :  { %s98_s5 = scalar_lea.hbm %s167_s3, 32 }
  0x22   :  { %p99_p13 = scmp.ne.s32.totalorder %s167_s3, %s98_s5  ;;  %p102_p0 = scmp.lt.u32.totalorder %s98_s5, %s167_s3 }
  0x24   :  { %p104_p1 = pnand %p102_p0, %p99_p13 }
  0x26   :  { %107 = shalt.err (!%p104_p1)
}
  0x27   :  { %56 = dma.vmem_to_hbm [thread:$0]  %s54_s0, 32, %s167_s3, [#allocation4]  }
  0x28   :  { %110 = dma.done.wait [#allocation4], 32  }
  0x29   :  { %111 = vsyncadd [#allocation4], 4294967264 }
  0x2a   :  { %60 = vsyncpa [#allocation3], 1 }
  0x2b   :  { %61 = vsyncpa [#allocation4], 1 }

</bundles_post_ra>
